<compile_context>
chip_gen: v6e
topology: v6e:2x2x1
jax: 0.10.0
libtpu: 0.0.40
codegen_flags: <defaults>
</compile_context>

<pallas_src>
import jax
import jax.numpy as jnp
from jax.experimental import pallas as pl
from jax.experimental.pallas import tpu as pltpu

ADD_CONST = 900.9009009009009


# ---------------------------------------------------------------------------
# Kernel: one (TCO, THW) output tile of  (W - I) @ x  + (b - c), NCHW-native.
#   x_ref: (Cin, THW) f32   w_ref: (TCO, Cin) bf16   b_ref: (TCO, 1) f32
#   o_ref: (TCO, THW) f32
# ---------------------------------------------------------------------------
def _conv1x1_sub_kernel(x_ref, w_ref, b_ref, o_ref):
    xb = x_ref[...].astype(jnp.bfloat16)               # VPU cast, hidden under MXU
    acc = jnp.dot(w_ref[...], xb, preferred_element_type=jnp.float32)
    o_ref[...] = (acc + b_ref[...]).astype(o_ref.dtype)


def conv1x1_sub(x_nchw, weight, bias):
    """Forward of: Conv2d(C, C, 1)(x) - (x + 900.9009009009009); NCHW in/out."""
    N, C, H, W = x_nchw.shape
    Cout, Cin = weight.shape[0], weight.shape[1]
    assert Cin == C and Cout == C, "v1 - x requires Cout == Cin"
    HW = H * W

    # Host-side folding:  x @ W^T + b - x - c  ==  x @ (W - I)^T + (b - c)
    w_eff = (weight.reshape(Cout, Cin).astype(jnp.float32)
             - jnp.eye(Cin, dtype=jnp.float32)).astype(jnp.bfloat16)
    b_eff = (bias.astype(jnp.float32) - ADD_CONST).reshape(Cout, 1)  # stays f32

    x_cm = x_nchw.reshape(N, C, HW)                    # reshape only, no transpose

    # HW (lane) tiling: full extent when small, lane-dense 512-wide tiles else.
    t_hw = HW if HW <= 512 else 512
    hw_tiles = pl.cdiv(HW, t_hw)

    # Cout (sublane) split: enough grid steps so weight-chunk DMA overlaps
    # compute and both v7x TensorCores get work even in the batch-1 case.
    if N * hw_tiles == 1 and Cout % 32 == 0:
        cout_tiles = 4
    elif Cout % 16 == 0:
        cout_tiles = 2
    else:
        cout_tiles = 1
    tco = Cout // cout_tiles

    cost = pl.CostEstimate(
        flops=2 * N * HW * C * Cout,
        transcendentals=0,
        bytes_accessed=4 * N * C * HW + 2 * C * Cout + 4 * Cout + 4 * N * Cout * HW,
    )
    vmem_needed = 2 * (4 * C * t_hw + 2 * tco * C + 4 * tco + 4 * tco * t_hw)
    vmem_limit = int(min(max(vmem_needed + (16 << 20), 32 << 20), 48 << 20))

    out_cm = pl.pallas_call(
        _conv1x1_sub_kernel,
        out_shape=jax.ShapeDtypeStruct((N, Cout, HW), jnp.float32),
        grid=(cout_tiles, N, hw_tiles),
        in_specs=[
            pl.BlockSpec((None, C, t_hw), lambda co, n, h: (n, 0, h)),   # x (NCHW slab)
            pl.BlockSpec((tco, C), lambda co, n, h: (co, 0)),            # W - I (bf16)
            pl.BlockSpec((tco, 1), lambda co, n, h: (co, 0)),            # b - c (f32)
        ],
        out_specs=pl.BlockSpec((None, tco, t_hw), lambda co, n, h: (n, co, h)),
        compiler_params=pltpu.CompilerParams(
            dimension_semantics=("parallel", "parallel", "parallel"),
            vmem_limit_bytes=vmem_limit,
        ),
        cost_estimate=cost,
    )(x_cm, w_eff, b_eff)
    return out_cm.reshape(N, Cout, H, W)


if __name__ == "__main__":
    key = jax.random.PRNGKey(0)
    kx, kw, kb, kx2 = jax.random.split(key, 4)

    N, C, H, W = 1, 768, 8, 8
    Cout = C

    # Deterministic synthetic parameters (PyTorch-default-like scale).
    fan_in = C
    bound = 1.0 / (fan_in ** 0.5)
    weight = jax.random.uniform(kw, (Cout, C, 1, 1), jnp.float32, -bound, bound)
    bias = jax.random.uniform(kb, (Cout,), jnp.float32, -bound, bound)

    def ref_fn(xx):
        conv = (jnp.einsum("oc,nchw->nohw", weight.reshape(Cout, C), xx)
                + bias.reshape(1, Cout, 1, 1))
        return conv - (xx + ADD_CONST)

    run = jax.jit(lambda xx: conv1x1_sub(xx, weight, bias))

    # Spec shape (batch 1): cout_tiles=4 latency path.
    x1 = jax.random.normal(kx, (N, C, H, W), dtype=jnp.float32)
    out1 = jax.block_until_ready(run(x1))
    ref1 = ref_fn(x1)
    assert out1.shape == (N, Cout, H, W)
    assert jnp.allclose(out1, ref1, atol=0.1, rtol=0)
    # Isolate the conv term at O(1) scale so precision regressions are visible
    # despite the ~900-magnitude outputs.
    assert jnp.allclose(out1 + x1 + ADD_CONST, ref1 + x1 + ADD_CONST, atol=0.1, rtol=0)

    # Batch 2: exercises N>1 grid axis / cout_tiles=2 path (still transpose-free).
    x2 = jax.random.normal(kx2, (2, C, H, W), dtype=jnp.float32)
    out2 = jax.block_until_ready(run(x2))
    ref2 = ref_fn(x2)
    assert out2.shape == (2, Cout, H, W)
    assert jnp.allclose(out2, ref2, atol=0.1, rtol=0)
    assert jnp.allclose(out2 + x2 + ADD_CONST, ref2 + x2 + ADD_CONST, atol=0.1, rtol=0)

    print("KERNEL_OK")
</pallas_src>

<mosaic_0001>
module attributes {stable_mosaic.version = 11 : i64} {
  func.func @_conv1x1_sub_kernel(%arg0: i32, %arg1: i32, %arg2: i32, %arg3: memref<1x768x64xf32, #tpu.memory_space<vmem>>, %arg4: memref<192x768xbf16, #tpu.memory_space<vmem>>, %arg5: memref<192x1xf32, #tpu.memory_space<vmem>>, %arg6: memref<1x192x64xf32, #tpu.memory_space<vmem>>) attributes {dimension_semantics = [#tpu.dimension_semantics<parallel>, #tpu.dimension_semantics<parallel>, #tpu.dimension_semantics<parallel>], iteration_bounds = array<i64: 4, 1, 1>, scalar_prefetch = 0 : i64, scratch_operands = 0 : i64, tpu.core_type = #tpu.core_type<tc>, window_params = [{transform_indices = @transform_0, window_bounds = array<i64: 1, 768, 64>}, {transform_indices = @transform_1, window_bounds = array<i64: 192, 768>}, {transform_indices = @transform_2, window_bounds = array<i64: 192, 1>}, {transform_indices = @transform_3, window_bounds = array<i64: 1, 192, 64>}]} {
    %c0 = arith.constant 0 : index
    %c0_0 = arith.constant 0 : index
    %c0_1 = arith.constant 0 : index
    %0 = vector.load %arg3[%c0, %c0_0, %c0_1] : memref<1x768x64xf32, #tpu.memory_space<vmem>>, vector<1x768x64xf32>
    %1 = vector.shape_cast %0 : vector<1x768x64xf32> to vector<768x64xf32>
    %2 = arith.truncf %1 : vector<768x64xf32> to vector<768x64xbf16>
    %c0_2 = arith.constant 0 : index
    %c0_3 = arith.constant 0 : index
    %3 = vector.load %arg4[%c0_2, %c0_3] : memref<192x768xbf16, #tpu.memory_space<vmem>>, vector<192x768xbf16>
    %cst = arith.constant dense<0.000000e+00> : vector<192x64xf32>
    %4 = tpu.matmul %3, %2, %cst {dimension_numbers = #tpu.dot_dimension_numbers<[1], [0], [0], [1], [0, 0, 1, 1], [], []>} : vector<192x768xbf16>, vector<768x64xbf16>, vector<192x64xf32> -> vector<192x64xf32>
    %c0_4 = arith.constant 0 : index
    %c0_5 = arith.constant 0 : index
    %5 = vector.load %arg5[%c0_4, %c0_5] : memref<192x1xf32, #tpu.memory_space<vmem>>, vector<192x1xf32>
    %6 = vector.broadcast %5 : vector<192x1xf32> to vector<192x64xf32>
    %7 = arith.addf %4, %6 : vector<192x64xf32>
    %c0_6 = arith.constant 0 : index
    %c0_7 = arith.constant 0 : index
    %c0_8 = arith.constant 0 : index
    %8 = vector.load %arg6[%c0_6, %c0_7, %c0_8] : memref<1x192x64xf32, #tpu.memory_space<vmem>>, vector<1x192x64xf32>
    %9 = vector.shape_cast %8 : vector<1x192x64xf32> to vector<192x64xf32>
    %10 = vector.shape_cast %7 : vector<192x64xf32> to vector<1x192x64xf32>
    tpu.vector_store %arg6[%c0_6, %c0_7, %c0_8], %10 {strides = array<i32>} : memref<1x192x64xf32, #tpu.memory_space<vmem>>, vector<1x192x64xf32>,
    return
  }
  func.func @transform_0(%arg0: i32, %arg1: i32, %arg2: i32) -> (i32, i32, i32) {
    %c0_i32 = arith.constant 0 : i32
    %c0_i32_0 = arith.constant 0 : i32
    return %arg1, %c0_i32, %arg2 : i32, i32, i32
  }
  func.func @transform_1(%arg0: i32, %arg1: i32, %arg2: i32) -> (i32, i32) {
    %c0_i32 = arith.constant 0 : i32
    %c0_i32_0 = arith.constant 0 : i32
    return %arg0, %c0_i32 : i32, i32
  }
  func.func @transform_2(%arg0: i32, %arg1: i32, %arg2: i32) -> (i32, i32) {
    %c0_i32 = arith.constant 0 : i32
    %c0_i32_0 = arith.constant 0 : i32
    return %arg0, %c0_i32 : i32, i32
  }
  func.func @transform_3(%arg0: i32, %arg1: i32, %arg2: i32) -> (i32, i32, i32) {
    %c0_i32 = arith.constant 0 : i32
    return %arg1, %arg0, %arg2 : i32, i32, i32
  }
}

</mosaic_0001>

<bundles_post_ra>
// kernel: _lambda_.1
= control target key start
LH: loop header
LB: loop body
LE: loop exit
PB: predicated region body
PF: predicated region fallthrough
CT: control target
= control target key end

     0   :  { %s2071_s12 = smov 0   ;;  %s2073_s13 = smov 0   ;;  %s2652_s0 = inlined_call_operand.vmem [shape: f32[1,768,64], index: 0, kind: input, shape index: {}]   ;;  %s2653_s1 = inlined_call_operand.vmem [shape: bf16[768,768], index: 1, kind: input, shape index: {}]   ;;  %s2654_s2 = inlined_call_operand.vmem [shape: f32[768,1], index: 2, kind: input, shape index: {}]   ;;  %s2655_s3 = inlined_call_operand.vmem [shape: f32[1,768,64], index: 3, kind: output, shape index: {}]  }
   0x1   :  { %s2075_s14 = smov 0  }
   0x2 LB: > { %s32_s15 = sadd.s32 1, %s2044_s13  ;;  %p1532_p0 = scmp.ge.s32.totalorder %s2048_s14, 1  ;;  %s2048_s14 = sphi %s2075_s14, %s13_s14   ;;  %s2044_s13 = sphi %s2073_s13, %s2657_s13   ;;  %s2040_s12 = sphi %s2071_s12, %s2656_s12  }
   0x3   : > { %p34_p1 = scmp.ge.s32.totalorder %s32_s15, 4  ;;  %p188_p2 = scmp.lt.s32.totalorder %s2048_s14, 5 }
   0x5   : > { %s2659_s15 = smov (%p34_p1, %s32_s15), 0  ;;  %p189_p3 = pnand %p1532_p0, %p188_p2 }
   0x6   : > { %s241_s22 = smul.u32 (!%p189_p3), 24, %s2040_s12 }
   0x7   : > { %192 = sbr.rel (%p189_p3) target bundleno = 389 (0x185), region = 32 }
   0x8   : > { %p242_p4 = scmp.lt.s32.totalorder (!%p189_p3), %s241_s22, 95 }
   0xc   : > { %v298_v0 = vld [vmem:[%s2652_s0 + $0xf0] sm:$0xff]  ;;  %v299_v1 = vld [vmem:[%s2652_s0 + $0xf8] sm:$0xff]  ;;  %v296_v5 = vld [vmem:[%s2652_s0 + $0xe0] sm:$0xff]  ;;  %v2050_v7 = vmov 0   ;;  %s2661_s22 = smov (!%p242_p4, %s241_s22), 95  ;;  %vm1375_vm0 = vcmask 523264  }
   0xd   : > { %v282_v2 = vld [vmem:[%s2652_s0 + $0x70] sm:$0xff]  ;;  %v379_v3 = vpack.c.bf16 %v299_v1, %v298_v0  ;;  %v283_v4 = vld [vmem:[%s2652_s0 + $0x78] sm:$0xff]  ;;  %v297_v6 = vld [vmem:[%s2652_s0 + $0xe8] sm:$0xff]  ;;  %1916 = vset.pattern.permute.xlu0 %v2050_v7  ;;  %1917 = vset.pattern.permute.xlu1 %v2050_v7  ;;  %s1890_s21 = smul.u32 24, %s2661_s22  ;;  %s1534_s28 = sshll.u32 %s2661_s22, 3 }
   0xe   : > { %v371_v8 = vpack.c.bf16 %v283_v4, %v282_v2  ;;  %v378_v9 = vpack.c.bf16 %v297_v6, %v296_v5  ;;  %v280_v10 = vld [vmem:[%s2652_s0 + $0x60] sm:$0xff]  ;;  %v281_v11 = vld [vmem:[%s2652_s0 + $0x68] sm:$0xff]  ;;  %v294_v12 = vld [vmem:[%s2652_s0 + $0xd0] sm:$0xff]  ;;  %s2357_s27 = scalar_lea.vmem %s2654_s2, %s1534_s28  ;;  %s2561_s19 = scalar_lea.vmem %s2655_s3, %s1534_s28 }
   0xf   : > { %1610 = vmatprep.subr.bf16.mxu0 %v379_v3  ;;  %1874 = vmatprep.subr.bf16.mxu1 %v379_v3  ;;  %v295_v13 = vld [vmem:[%s2652_s0 + $0xd8] sm:$0xff]  ;;  %v370_v14 = vpack.c.bf16 %v281_v11, %v280_v10  ;;  %v278_v16 = vld [vmem:[%s2652_s0 + $0x50] sm:$0xff]  ;;  %v292_v18 = vld [vmem:[%s2652_s0 + $0xc0] sm:$0xff]  ;;  %s2140_s25 = scalar_lea.vmem %s2653_s1, %s1890_s21 }
  0x10   : > { %1611 = vmatpush3.bf16.msra.mxu0 %v371_v8  ;;  %1882 = vmatpush3.bf16.msra.mxu1 %v371_v8  ;;  %v377_v15 = vpack.c.bf16 %v295_v13, %v294_v12  ;;  %v279_v17 = vld [vmem:[%s2652_s0 + $0x58] sm:$0xff]  ;;  %v293_v19 = vld [vmem:[%s2652_s0 + $0xc8] sm:$0xff]  ;;  %v276_v22 = vld [vmem:[%s2652_s0 + $0x40] sm:$0xff] }
  0x11   : > { %1612 = vmatprep.subr.bf16.mxu0 %v378_v9  ;;  %1875 = vmatprep.subr.bf16.mxu1 %v378_v9  ;;  %v369_v20 = vpack.c.bf16 %v279_v17, %v278_v16  ;;  %v376_v21 = vpack.c.bf16 %v293_v19, %v292_v18  ;;  %v277_v23 = vld [vmem:[%s2652_s0 + $0x48] sm:$0xff]  ;;  %v290_v24 = vld [vmem:[%s2652_s0 + $0xb0] sm:$0xff]  ;;  %v291_v25 = vld [vmem:[%s2652_s0 + $0xb8] sm:$0xff] }
  0x12   : > { %v1920_v26 = vld [vmem:[%s2140_s25 + $0x4] ss:$24 sps:$4 sm:$0xff]   ;;  %v368_v27 = vpack.c.bf16 %v277_v23, %v276_v22  ;;  %v375_v28 = vpack.c.bf16 %v291_v25, %v290_v24  ;;  %v274_v29 = vld [vmem:[%s2652_s0 + $0x30] sm:$0xff]  ;;  %v289_v33 = vld [vmem:[%s2652_s0 + $0xa8] sm:$0xff] }
  0x13   : > { %v275_v30 = vld [vmem:[%s2652_s0 + $0x38] sm:$0xff]  ;;  %v288_v32 = vld [vmem:[%s2652_s0 + $0xa0] sm:$0xff]  ;;  %1020 = vmatprep.mubr.bf16.mxu0 %v1920_v26  ;;  %v273_v37 = vld [vmem:[%s2652_s0 + $0x28] sm:$0xff] }
  0x14   : > { %1613 = vmatpush3.bf16.msra.mxu0 %v370_v14  ;;  %1883 = vmatpush3.bf16.msra.mxu1 %v370_v14  ;;  %v1923_v31 = vld [vmem:[%s2140_s25 + $0x124] ss:$24 sps:$4 sm:$0xff]   ;;  %v367_v34 = vpack.c.bf16 %v275_v30, %v274_v29  ;;  %v374_v36 = vpack.c.bf16 %v289_v33, %v288_v32  ;;  %v286_v38 = vld [vmem:[%s2652_s0 + $0x90] sm:$0xff]  ;;  %v285_v45 = vld [vmem:[%s2652_s0 + $0x88] sm:$0xff] }
  0x15   : > { %1614 = vmatprep.subr.bf16.mxu0 %v377_v15  ;;  %1876 = vmatprep.subr.bf16.mxu1 %v377_v15  ;;  %v272_v35 = vld [vmem:[%s2652_s0 + $0x20] sm:$0xff]  ;;  %v287_v39 = vld [vmem:[%s2652_s0 + $0x98] sm:$0xff]  ;;  %v270_v42 = vld [vmem:[%s2652_s0 + $0x10] sm:$0xff] }
  0x16   : > { %1068 = vmatprep.mubr.bf16.mxu1 %v1923_v31  ;;  %v366_v40 = vpack.c.bf16 %v273_v37, %v272_v35  ;;  %v373_v41 = vpack.c.bf16 %v287_v39, %v286_v38  ;;  %v271_v43 = vld [vmem:[%s2652_s0 + $0x18] sm:$0xff]  ;;  %v284_v44 = vld [vmem:[%s2652_s0 + $0x80] sm:$0xff]  ;;  %v269_v49 = vld [vmem:[%s2652_s0 + $0x8] sm:$0xff] }
  0x17   : > { %v365_v46 = vpack.c.bf16 %v271_v43, %v270_v42  ;;  %v372_v47 = vpack.c.bf16 %v285_v45, %v284_v44  ;;  %v268_v48 = vld [vmem:[%s2652_s0] sm:$0xff]  ;;  %v330_v50 = vld [vmem:[%s2652_s0 + $0x1f0] sm:$0xff]  ;;  %v331_v51 = vld [vmem:[%s2652_s0 + $0x1f8] sm:$0xff] }
  0x18   : > { %1615 = vmatpush3.bf16.msra.mxu0 %v369_v20  ;;  %1884 = vmatpush3.bf16.msra.mxu1 %v369_v20  ;;  %v362_v52 = vld [vmem:[%s2652_s0 + $0x2f0] sm:$0xff]  ;;  %v363_v53 = vld [vmem:[%s2652_s0 + $0x2f8] sm:$0xff]  ;;  %v364_v55 = vpack.c.bf16 %v269_v49, %v268_v48  ;;  %v395_v61 = vpack.c.bf16 %v331_v51, %v330_v50  ;;  %v328_v63 = vld [vmem:[%s2652_s0 + $0x1e0] sm:$0xff] }
  0x19   : > { %1616 = vmatprep.subr.bf16.mxu0 %v376_v21  ;;  %1877 = vmatprep.subr.bf16.mxu1 %v376_v21  ;;  %v314_v54 = vld [vmem:[%s2652_s0 + $0x170] sm:$0xff]  ;;  %v315_v56 = vld [vmem:[%s2652_s0 + $0x178] sm:$0xff]  ;;  %v411_v62 = vpack.c.bf16 %v363_v53, %v362_v52  ;;  %v329_v0 = vld [vmem:[%s2652_s0 + $0x1e8] sm:$0xff] }
  0x1a   : > { %v346_v57 = vld [vmem:[%s2652_s0 + $0x270] sm:$0xff]  ;;  %v347_v58 = vld [vmem:[%s2652_s0 + $0x278] sm:$0xff]  ;;  %v360_v2 = vld [vmem:[%s2652_s0 + $0x2e0] sm:$0xff]  ;;  %v387_v4 = vpack.c.bf16 %v315_v56, %v314_v54  ;;  %v394_v9 = vpack.c.bf16 %v329_v0, %v328_v63 }
  0x1b   : > { %v1918_v59 = vld [vmem:[%s2140_s25] ss:$24 sps:$4 sm:$0xff]   ;;  %v1924_v1 = vld [vmem:[%s2140_s25 + $0x34] ss:$24 sps:$4 sm:$0xff]   ;;  %v403_v5 = vpack.c.bf16 %v347_v58, %v346_v57  ;;  %v1928_v19 = vld [vmem:[%s2140_s25 + $0x30] ss:$24 sps:$4 sm:$0xff]  }
  0x1c   : > { %1617 = vmatpush3.bf16.msra.mxu0 %v368_v27  ;;  %1885 = vmatpush3.bf16.msra.mxu1 %v368_v27  ;;  %v1921_v60 = vld [vmem:[%s2140_s25 + $0x120] ss:$24 sps:$4 sm:$0xff]   ;;  %v361_v3 = vld [vmem:[%s2652_s0 + $0x2e8] sm:$0xff]  ;;  %v326_v12 = vld [vmem:[%s2652_s0 + $0x1d0] sm:$0xff] }
  0x1d   : > { %1618 = vmatprep.subr.bf16.mxu0 %v375_v28  ;;  %1878 = vmatprep.subr.bf16.mxu1 %v375_v28  ;;  %v1926_v6 = vld [vmem:[%s2140_s25 + $0x154] ss:$24 sps:$4 sm:$0xff]   ;;  %v312_v7 = vld [vmem:[%s2652_s0 + $0x160] sm:$0xff]  ;;  %v410_v13 = vpack.c.bf16 %v361_v3, %v360_v2  ;;  %v327_v14 = vld [vmem:[%s2652_s0 + $0x1d8] sm:$0xff] }
  0x1e   : > { %v313_v8 = vld [vmem:[%s2652_s0 + $0x168] sm:$0xff]  ;;  %v344_v10 = vld [vmem:[%s2652_s0 + $0x260] sm:$0xff]  ;;  %v358_v15 = vld [vmem:[%s2652_s0 + $0x2d0] sm:$0xff]  ;;  %v393_v21 = vpack.c.bf16 %v327_v14, %v326_v12 }
  0x1f   : > { %v345_v11 = vld [vmem:[%s2652_s0 + $0x268] sm:$0xff]  ;;  %v359_v16 = vld [vmem:[%s2652_s0 + $0x2d8] sm:$0xff]  ;;  %v386_v17 = vpack.c.bf16 %v313_v8, %v312_v7  ;;  %v310_v22 = vld [vmem:[%s2652_s0 + $0x150] sm:$0xff] }
  0x20   : > { %1619 = vmatpush3.bf16.msra.mxu0 %v367_v34  ;;  %1886 = vmatpush3.bf16.msra.mxu1 %v367_v34  ;;  %v402_v18 = vpack.c.bf16 %v345_v11, %v344_v10  ;;  %v1929_v20 = vld [vmem:[%s2140_s25 + $0x150] ss:$24 sps:$4 sm:$0xff]   ;;  %v311_v23 = vld [vmem:[%s2652_s0 + $0x158] sm:$0xff]  ;;  %v409_v24 = vpack.c.bf16 %v359_v16, %v358_v15  ;;  %v324_v28 = vld [vmem:[%s2652_s0 + $0x1c0] sm:$0xff] }
  0x21   : > { %1620 = vmatprep.subr.bf16.mxu0 %v374_v36  ;;  %1879 = vmatprep.subr.bf16.mxu1 %v374_v36  ;;  %v1930_v25 = vld [vmem:[%s2140_s25 + $0x64] ss:$24 sps:$4 sm:$0xff]   ;;  %v342_v26 = vld [vmem:[%s2652_s0 + $0x250] sm:$0xff]  ;;  %v325_v30 = vld [vmem:[%s2652_s0 + $0x1c8] sm:$0xff]  ;;  %v385_v33 = vpack.c.bf16 %v311_v23, %v310_v22 }
  0x22   : > { %v343_v27 = vld [vmem:[%s2652_s0 + $0x258] sm:$0xff]  ;;  %v356_v31 = vld [vmem:[%s2652_s0 + $0x2c0] sm:$0xff]  ;;  %v357_v32 = vld [vmem:[%s2652_s0 + $0x2c8] sm:$0xff] }
  0x23   : > { %v1932_v29 = vld [vmem:[%s2140_s25 + $0x184] ss:$24 sps:$4 sm:$0xff]   ;;  %v309_v35 = vld [vmem:[%s2652_s0 + $0x148] sm:$0xff]  ;;  %v401_v37 = vpack.c.bf16 %v343_v27, %v342_v26  ;;  %v322_v39 = vld [vmem:[%s2652_s0 + $0x1b0] sm:$0xff]  ;;  %v408_v42 = vpack.c.bf16 %v357_v32, %v356_v31 }
  0x24   : > { %1621 = vmatpush3.bf16.msra.mxu0 %v366_v40  ;;  %1887 = vmatpush3.bf16.msra.mxu1 %v366_v40  ;;  %v308_v34 = vld [vmem:[%s2652_s0 + $0x140] sm:$0xff]  ;;  %v341_v38 = vld [vmem:[%s2652_s0 + $0x248] sm:$0xff]  ;;  %v323_v40 = vld [vmem:[%s2652_s0 + $0x1b8] sm:$0xff] }
  0x25   : > { %1622 = vmatprep.subr.bf16.mxu0 %v373_v41  ;;  %1880 = vmatprep.subr.bf16.mxu1 %v373_v41  ;;  %v340_v36 = vld [vmem:[%s2652_s0 + $0x240] sm:$0xff]  ;;  %v392_v41 = vpack.c.bf16 %v325_v30, %v324_v28  ;;  %v354_v43 = vld [vmem:[%s2652_s0 + $0x2b0] sm:$0xff]  ;;  %v355_v44 = vld [vmem:[%s2652_s0 + $0x2b8] sm:$0xff]  ;;  %v384_v45 = vpack.c.bf16 %v309_v35, %v308_v34  ;;  %v391_v49 = vpack.c.bf16 %v323_v40, %v322_v39 }
  0x26   : > { %v400_v48 = vpack.c.bf16 %v341_v38, %v340_v36  ;;  %v306_v50 = vld [vmem:[%s2652_s0 + $0x130] sm:$0xff]  ;;  %v307_v51 = vld [vmem:[%s2652_s0 + $0x138] sm:$0xff]  ;;  %v407_v54 = vpack.c.bf16 %v355_v44, %v354_v43  ;;  %v320_v57 = vld [vmem:[%s2652_s0 + $0x1a0] sm:$0xff] }
  0x27   : > { %v1936_v52 = vld [vmem:[%s2140_s25 + $0x94] ss:$24 sps:$4 sm:$0xff]   ;;  %v339_v56 = vld [vmem:[%s2652_s0 + $0x238] sm:$0xff]  ;;  %v336_v63 = vld [vmem:[%s2652_s0 + $0x220] sm:$0xff]  ;;  %v383_v0 = vpack.c.bf16 %v307_v51, %v306_v50 }
  0x28   : > { %1623 = vmatpush3.bf16.msra.mxu0 %v365_v46  ;;  %1888 = vmatpush3.bf16.msra.mxu1 %v365_v46  ;;  %v1934_v46 = vld [vmem:[%s2140_s25 + $0x60] ss:$24 sps:$4 sm:$0xff]   ;;  %v1938_v53 = vld [vmem:[%s2140_s25 + $0x1b4] ss:$24 sps:$4 sm:$0xff]   ;;  %v1940_v12 = vld [vmem:[%s2140_s25 + $0x90] ss:$24 sps:$4 sm:$0xff]  }
  0x29   : > { %1624 = vmatprep.subr.bf16.mxu0 %v372_v47  ;;  %1881 = vmatprep.subr.bf16.mxu1 %v372_v47  ;;  %v1935_v47 = vld [vmem:[%s2140_s25 + $0x180] ss:$24 sps:$4 sm:$0xff]   ;;  %v321_v58 = vld [vmem:[%s2652_s0 + $0x1a8] sm:$0xff]  ;;  %v350_v7 = vld [vmem:[%s2652_s0 + $0x290] sm:$0xff] }
  0x2a   : > { %v337_v2 = vld [vmem:[%s2652_s0 + $0x228] sm:$0xff]  ;;  %v390_v3 = vpack.c.bf16 %v321_v58, %v320_v57  ;;  %v351_v8 = vld [vmem:[%s2652_s0 + $0x298] sm:$0xff]  ;;  %v302_v10 = vld [vmem:[%s2652_s0 + $0x110] sm:$0xff] }
  0x2b   : > { %v486_v11 = vld [vmem:[%s2357_s27 + $0x10] sm:$0xff]  ;;  %v398_v15 = vpack.c.bf16 %v337_v2, %v336_v63  ;;  %v303_v16 = vld [vmem:[%s2652_s0 + $0x118] sm:$0xff]  ;;  %v316_v22 = vld [vmem:[%s2652_s0 + $0x180] sm:$0xff] }
  0x2c   : > { %1625 = vmatpush3.bf16.msra.mxu0 %v364_v55  ;;  %1889 = vmatpush3.bf16.msra.mxu1 %v364_v55  ;;  %v338_v55 = vld [vmem:[%s2652_s0 + $0x230] sm:$0xff]  ;;  %v317_v23 = vld [vmem:[%s2652_s0 + $0x188] sm:$0xff]  ;;  %v1944_v26 = vld [vmem:[%s2140_s25 + $0x1e4] ss:$24 sps:$4 sm:$0xff]   ;;  %v381_v27 = vpack.c.bf16 %v303_v16, %v302_v10 }
  0x2d   : > { %1698 = vmatprep.subr.bf16.mxu1 %v395_v61  ;;  %1786 = vmatprep.subr.bf16.mxu0 %v411_v62  ;;  %v304_v61 = vld [vmem:[%s2652_s0 + $0x120] sm:$0xff]  ;;  %v305_v62 = vld [vmem:[%s2652_s0 + $0x128] sm:$0xff]  ;;  %v388_v30 = vpack.c.bf16 %v317_v23, %v316_v22  ;;  %v487_v36 = vld [vmem:[%s2357_s27 + $0x18] sm:$0xff] }
  0x2e   : > { %v382_v14 = vpack.c.bf16 %v305_v62, %v304_v61  ;;  %520 = vperm.xlu1 %1917, %v486_v11   ;;  %v301_v31 = vld [vmem:[%s2652_s0 + $0x108] sm:$0xff]  ;;  %v1946_v39 = vld [vmem:[%s2140_s25 + $0xc0] ss:$24 sps:$4 sm:$0xff]   ;;  %v1960_v57 = vld [vmem:[%s2140_s25 + $0x3c] ss:$24 sps:$4 sm:$0xff]  }
  0x2f   : > { %1021 = vmatmul.mubr.bf16.vlgmr.msra.gmra.mxu0 %v1918_v59  ;;  %1069 = vmatmul.mubr.bf16.vlgmr.msra.gmra.mxu1 %v1921_v60  ;;  %v352_v59 = vld [vmem:[%s2652_s0 + $0x2a0] sm:$0xff]  ;;  %v353_v60 = vld [vmem:[%s2652_s0 + $0x2a8] sm:$0xff]  ;;  %v498_v61 = vld [vmem:[%s2357_s27 + $0x70] sm:$0xff] }
  0x30   : > { %1699 = vmatpush3.bf16.msra.mxu1 %v387_v4  ;;  %1787 = vmatpush3.bf16.msra.mxu0 %v403_v5  ;;  %v406_v4 = vpack.c.bf16 %v353_v60, %v352_v59  ;;  %v318_v5 = vld [vmem:[%s2652_s0 + $0x190] sm:$0xff]  ;;  %v333_v34 = vld [vmem:[%s2652_s0 + $0x208] sm:$0xff]  ;;  %v1947_v40 = vld [vmem:[%s2140_s25 + $0x1e0] ss:$24 sps:$4 sm:$0xff]  }
  0x31   : > { %1700 = vmatprep.subr.bf16.mxu1 %v394_v9  ;;  %1028 = vmatprep.mubr.bf16.mxu0 %v1924_v1  ;;  %v399_v1 = vpack.c.bf16 %v339_v56, %v338_v55  ;;  %v484_v9 = vld [vmem:[%s2357_s27] sm:$0xff]  ;;  %v485_v35 = vld [vmem:[%s2357_s27 + $0x8] sm:$0xff]  ;;  %v499_v62 = vld [vmem:[%s2357_s27 + $0x78] sm:$0xff] }
  0x32   : > { %1076 = vmatprep.mubr.bf16.mxu1 %v1926_v6  ;;  %1788 = vmatprep.subr.bf16.mxu0 %v410_v13  ;;  %v319_v6 = vld [vmem:[%s2652_s0 + $0x198] sm:$0xff]  ;;  %v1941_v13 = vld [vmem:[%s2140_s25 + $0x1b0] ss:$24 sps:$4 sm:$0xff]   ;;  %v488_v43 = vld [vmem:[%s2357_s27 + $0x20] sm:$0xff] }
  0x33   : > { %510 = vperm.xlu0 %1916, %v484_v9   ;;  %525 = vperm.xlu1 %1917, %v487_v36   ;;  %v489_v44 = vld [vmem:[%s2357_s27 + $0x28] sm:$0xff]  ;;  %v492_v51 = vld [vmem:[%s2357_s27 + $0x40] sm:$0xff]  ;;  %v1964_v63 = vld [vmem:[%s2140_s25 + $0x38] ss:$24 sps:$4 sm:$0xff]  }
  0x34   : > { %1701 = vmatpush3.bf16.msra.mxu1 %v386_v17  ;;  %1789 = vmatpush3.bf16.msra.mxu0 %v402_v18  ;;  %v334_v17 = vld [vmem:[%s2652_s0 + $0x210] sm:$0xff]  ;;  %v1942_v18 = vld [vmem:[%s2140_s25 + $0xc4] ss:$24 sps:$4 sm:$0xff]   ;;  %v1954_v55 = vld [vmem:[%s2140_s25 + $0x8] ss:$24 sps:$4 sm:$0xff]  }
  0x35   : > { %1702 = vmatprep.subr.bf16.mxu1 %v393_v21  ;;  %1790 = vmatprep.subr.bf16.mxu0 %v409_v24  ;;  %v335_v21 = vld [vmem:[%s2652_s0 + $0x218] sm:$0xff]  ;;  %v348_v24 = vld [vmem:[%s2652_s0 + $0x280] sm:$0xff]  ;;  %v1959_v50 = vld [vmem:[%s2140_s25 + $0x14] ss:$24 sps:$4 sm:$0xff]  }
  0x36   : > { %v397_v28 = vpack.c.bf16 %v335_v21, %v334_v17  ;;  %v1957_v56 = vld [vmem:[%s2140_s25 + $0x10] ss:$24 sps:$4 sm:$0xff]   ;;  %v1962_v58 = vld [vmem:[%s2140_s25 + $0x44] ss:$24 sps:$4 sm:$0xff]   ;;  %v1968_v2 = vld [vmem:[%s2140_s25 + $0x74] ss:$24 sps:$4 sm:$0xff]  }
  0x37   : > { %1029 = vmatmul.mubr.bf16.gmra.mxu0 %v1928_v19  ;;  %1077 = vmatmul.mubr.bf16.gmra.mxu1 %v1929_v20  ;;  %v389_v19 = vpack.c.bf16 %v319_v6, %v318_v5  ;;  %v405_v20 = vpack.c.bf16 %v351_v8, %v350_v7  ;;  %v496_v59 = vld [vmem:[%s2357_s27 + $0x60] sm:$0xff]  ;;  %v497_v60 = vld [vmem:[%s2357_s27 + $0x68] sm:$0xff]  ;;  %v502_v5 = vld [vmem:[%s2357_s27 + $0x90] sm:$0xff] }
  0x38   : > { %1703 = vmatpush3.bf16.msra.mxu1 %v385_v33  ;;  %1036 = vmatprep.mubr.bf16.mxu0 %v1930_v25  ;;  %v349_v25 = vld [vmem:[%s2652_s0 + $0x288] sm:$0xff]  ;;  %v332_v33 = vld [vmem:[%s2652_s0 + $0x200] sm:$0xff]  ;;  %v503_v6 = vld [vmem:[%s2357_s27 + $0x98] sm:$0xff] }
  0x39   : > { %1084 = vmatprep.mubr.bf16.mxu1 %v1932_v29  ;;  %1791 = vmatpush3.bf16.msra.mxu0 %v401_v37  ;;  %v300_v29 = vld [vmem:[%s2652_s0 + $0x100] sm:$0xff]  ;;  %v404_v32 = vpack.c.bf16 %v349_v25, %v348_v24  ;;  %v396_v38 = vpack.c.bf16 %v333_v34, %v332_v33  ;;  %v1971_v8 = vld [vmem:[%s2140_s25 + $0x70] ss:$24 sps:$4 sm:$0xff]   ;;  %v1972_v9 = vld [vmem:[%s2140_s25 + $0x9c] ss:$24 sps:$4 sm:$0xff]  }
  0x3a   : > { %1704 = vmatprep.subr.bf16.mxu1 %v392_v41  ;;  %1792 = vmatprep.subr.bf16.mxu0 %v408_v42  ;;  %v380_v37 = vpack.c.bf16 %v301_v31, %v300_v29  ;;  %v1948_v41 = vld [vmem:[%s2140_s25 + $0xf4] ss:$24 sps:$4 sm:$0xff]   ;;  %v1970_v7 = vld [vmem:[%s2140_s25 + $0x68] ss:$24 sps:$4 sm:$0xff]   ;;  %v1974_v10 = vld [vmem:[%s2140_s25 + $0xa4] ss:$24 sps:$4 sm:$0xff]  }
  0x3b   : > { %515 = vperm.xlu0 %1916, %v485_v35   ;;  %v1950_v42 = vld [vmem:[%s2140_s25 + $0x214] ss:$24 sps:$4 sm:$0xff]   ;;  %535 = vperm.xlu1 %1917, %v489_v44   ;;  %v504_v11 = vld [vmem:[%s2357_s27 + $0xa0] sm:$0xff]  ;;  %v1988_v23 = vld [vmem:[%s2140_s25 + $0xf8] ss:$24 sps:$4 sm:$0xff]  }
  0x3c   : > { %1705 = vmatpush3.bf16.msra.mxu1 %v384_v45  ;;  %v1952_v45 = vld [vmem:[%s2140_s25 + $0xf0] ss:$24 sps:$4 sm:$0xff]   ;;  %v1977_v16 = vld [vmem:[%s2140_s25 + $0xa0] ss:$24 sps:$4 sm:$0xff]   ;;  %v1978_v17 = vld [vmem:[%s2140_s25 + $0xcc] ss:$24 sps:$4 sm:$0xff]  }
  0x3d   : > { %1793 = vmatpush3.bf16.msra.mxu0 %v400_v48  ;;  %1706 = vmatprep.subr.bf16.mxu1 %v391_v49  ;;  %v1953_v48 = vld [vmem:[%s2140_s25 + $0x210] ss:$24 sps:$4 sm:$0xff]   ;;  %v1956_v49 = vld [vmem:[%s2140_s25 + $0xc] ss:$24 sps:$4 sm:$0xff]   ;;  %v1984_v21 = vld [vmem:[%s2140_s25 + $0xfc] ss:$24 sps:$4 sm:$0xff]  }
  0x3e   : > { %1794 = vmatprep.subr.bf16.mxu0 %v407_v54  ;;  %v495_v54 = vld [vmem:[%s2357_s27 + $0x58] sm:$0xff]  ;;  %v1990_v25 = vld [vmem:[%s2140_s25 + $0x12c] ss:$24 sps:$4 sm:$0xff]   ;;  %v2006_v35 = vld [vmem:[%s2140_s25 + $0x188] ss:$24 sps:$4 sm:$0xff]  }
  0x3f   : > { %1037 = vmatmul.mubr.bf16.gmra.mxu0 %v1934_v46  ;;  %1085 = vmatmul.mubr.bf16.gmra.mxu1 %v1935_v47  ;;  %v490_v46 = vld [vmem:[%s2357_s27 + $0x30] sm:$0xff]  ;;  %v491_v47 = vld [vmem:[%s2357_s27 + $0x38] sm:$0xff]  ;;  %v2002_v33 = vld [vmem:[%s2140_s25 + $0x18c] ss:$24 sps:$4 sm:$0xff]  }
  0x40   : > { %1044 = vmatprep.mubr.bf16.mxu0 %v1936_v52  ;;  %1092 = vmatprep.mubr.bf16.mxu1 %v1938_v53  ;;  %v493_v52 = vld [vmem:[%s2357_s27 + $0x48] sm:$0xff]  ;;  %v494_v53 = vld [vmem:[%s2357_s27 + $0x50] sm:$0xff]  ;;  %v1986_v22 = vld [vmem:[%s2140_s25 + $0x104] ss:$24 sps:$4 sm:$0xff]  }
  0x41   : > { %1707 = vmatpush3.bf16.msra.mxu1 %v383_v0  ;;  %1795 = vmatpush3.bf16.msra.mxu0 %v399_v1  ;;  %v1965_v0 = vld [vmem:[%s2140_s25 + $0x40] ss:$24 sps:$4 sm:$0xff]   ;;  %v1966_v1 = vld [vmem:[%s2140_s25 + $0x6c] ss:$24 sps:$4 sm:$0xff]   ;;  %v1996_v29 = vld [vmem:[%s2140_s25 + $0x15c] ss:$24 sps:$4 sm:$0xff]  }
  0x42   : > { %1708 = vmatprep.subr.bf16.mxu1 %v390_v3  ;;  %1796 = vmatprep.subr.bf16.mxu0 %v406_v4  ;;  %v500_v3 = vld [vmem:[%s2357_s27 + $0x80] sm:$0xff]  ;;  %v501_v4 = vld [vmem:[%s2357_s27 + $0x88] sm:$0xff]  ;;  %v2000_v31 = vld [vmem:[%s2140_s25 + $0x158] ss:$24 sps:$4 sm:$0xff]  }
  0x43   : > { %530 = vperm.xlu0 %1916, %v488_v43   ;;  %545 = vperm.xlu1 %1917, %v491_v47   ;;  %v1989_v24 = vld [vmem:[%s2140_s25 + $0x100] ss:$24 sps:$4 sm:$0xff]   ;;  %v2004_v34 = vld [vmem:[%s2140_s25 + $0x194] ss:$24 sps:$4 sm:$0xff]   ;;  %v2007_v36 = vld [vmem:[%s2140_s25 + $0x190] ss:$24 sps:$4 sm:$0xff]  }
  0x44   : > { %v2018_v43 = vld [vmem:[%s2140_s25 + $0x1e8] ss:$24 sps:$4 sm:$0xff]   ;;  %v2024_v47 = vld [vmem:[%s2140_s25 + $0x218] ss:$24 sps:$4 sm:$0xff]  }
  0x45   : > { %1709 = vmatpush3.bf16.msra.mxu1 %v382_v14  ;;  %1797 = vmatpush3.bf16.msra.mxu0 %v398_v15  ;;  %v507_v14 = vld [vmem:[%s2357_s27 + $0xb8] sm:$0xff]  ;;  %v2019_v44 = vld [vmem:[%s2140_s25 + $0x1f0] ss:$24 sps:$4 sm:$0xff]  }
  0x46   : > { %1710 = vmatprep.subr.bf16.mxu1 %v389_v19  ;;  %1798 = vmatprep.subr.bf16.mxu0 %v405_v20  ;;  %v1976_v15 = vld [vmem:[%s2140_s25 + $0x98] ss:$24 sps:$4 sm:$0xff]   ;;  %v1982_v19 = vld [vmem:[%s2140_s25 + $0xc8] ss:$24 sps:$4 sm:$0xff]  }
  0x47   : > { %1045 = vmatmul.mubr.bf16.gmra.mxu0 %v1940_v12  ;;  %1093 = vmatmul.mubr.bf16.gmra.mxu1 %v1941_v13  ;;  %v505_v12 = vld [vmem:[%s2357_s27 + $0xa8] sm:$0xff]  ;;  %v506_v13 = vld [vmem:[%s2357_s27 + $0xb0] sm:$0xff] }
  0x48   : > { %1052 = vmatprep.mubr.bf16.mxu0 %v1942_v18  ;;  %1100 = vmatprep.mubr.bf16.mxu1 %v1944_v26  ;;  %v1980_v18 = vld [vmem:[%s2140_s25 + $0xd4] ss:$24 sps:$4 sm:$0xff]   ;;  %v1983_v20 = vld [vmem:[%s2140_s25 + $0xd0] ss:$24 sps:$4 sm:$0xff]  }
  0x49   : > { %1711 = vmatpush3.bf16.msra.mxu1 %v381_v27  ;;  %1799 = vmatpush3.bf16.msra.mxu0 %v397_v28  ;;  %v1992_v26 = vld [vmem:[%s2140_s25 + $0x134] ss:$24 sps:$4 sm:$0xff]   ;;  %v1994_v27 = vld [vmem:[%s2140_s25 + $0x128] ss:$24 sps:$4 sm:$0xff]  }
  0x4a   : > { %1712 = vmatprep.subr.bf16.mxu1 %v388_v30  ;;  %1800 = vmatprep.subr.bf16.mxu0 %v404_v32  ;;  %v1995_v28 = vld [vmem:[%s2140_s25 + $0x130] ss:$24 sps:$4 sm:$0xff]   ;;  %v1998_v30 = vld [vmem:[%s2140_s25 + $0x164] ss:$24 sps:$4 sm:$0xff]   ;;  %v2001_v32 = vld [vmem:[%s2140_s25 + $0x160] ss:$24 sps:$4 sm:$0xff]  }
  0x4b   : > { %540 = vperm.xlu0 %1916, %v490_v46   ;;  %555 = vperm.xlu1 %1917, %v493_v52   ;;  %v2022_v46 = vld [vmem:[%s2140_s25 + $0x224] ss:$24 sps:$4 sm:$0xff]  }
  0x4d   : > { %1713 = vmatpush3.bf16.msra.mxu1 %v380_v37  ;;  %1801 = vmatpush3.bf16.msra.mxu0 %v396_v38  ;;  %v2008_v37 = vld [vmem:[%s2140_s25 + $0x1bc] ss:$24 sps:$4 sm:$0xff]  }
  0x4e   : > { %v2010_v38 = vld [vmem:[%s2140_s25 + $0x1c4] ss:$24 sps:$4 sm:$0xff]  }
  0x4f   : > { %1053 = vmatmul.mubr.bf16.gmra.mxu0 %v1946_v39  ;;  %1101 = vmatmul.mubr.bf16.gmra.mxu1 %v1947_v40  ;;  %v2012_v39 = vld [vmem:[%s2140_s25 + $0x1b8] ss:$24 sps:$4 sm:$0xff]  }
  0x50   : > { %1060 = vmatprep.mubr.bf16.mxu0 %v1948_v41  ;;  %1108 = vmatprep.mubr.bf16.mxu1 %v1950_v42  ;;  %v2013_v40 = vld [vmem:[%s2140_s25 + $0x1c0] ss:$24 sps:$4 sm:$0xff]   ;;  %v2014_v41 = vld [vmem:[%s2140_s25 + $0x1ec] ss:$24 sps:$4 sm:$0xff]  }
  0x51   : > { %550 = vperm.xlu0 %1916, %v492_v51   ;;  %565 = vperm.xlu1 %1917, %v495_v54   ;;  %v2016_v42 = vld [vmem:[%s2140_s25 + $0x1f4] ss:$24 sps:$4 sm:$0xff]  }
  0x55   : > { %560 = vperm.xlu0 %1916, %v494_v53   ;;  %575 = vperm.xlu1 %1917, %v497_v60  }
  0x57   : > { %1061 = vmatmul.mubr.bf16.gmra.mxu0 %v1952_v45  ;;  %1109 = vmatmul.mubr.bf16.gmra.mxu1 %v1953_v48  ;;  %v2020_v45 = vld [vmem:[%s2140_s25 + $0x21c] ss:$24 sps:$4 sm:$0xff]   ;;  %v2025_v48 = vld [vmem:[%s2140_s25 + $0x220] ss:$24 sps:$4 sm:$0xff]  }
  0x58   : > { %1149 = vmatprep.mubr.bf16.mxu1 %v1956_v49  ;;  %1278 = vmatprep.mubr.bf16.mxu0 %v1959_v50 }
  0x59   : > { %570 = vperm.xlu0 %1916, %v496_v59   ;;  %585 = vperm.xlu1 %1917, %v499_v62  }
  0x5d   : > { %580 = vperm.xlu0 %1916, %v498_v61   ;;  %595 = vperm.xlu1 %1917, %v501_v4  }
  0x5f   : > { %1150 = vmatmul.mubr.bf16.vlgmr.msra.gmra.mxu1 %v1954_v55  ;;  %1279 = vmatmul.mubr.bf16.vlgmr.msra.gmra.mxu0 %v1957_v56 }
  0x60   : > { %1157 = vmatprep.mubr.bf16.mxu1 %v1960_v57  ;;  %1286 = vmatprep.mubr.bf16.mxu0 %v1962_v58 }
  0x61   : > { %590 = vperm.xlu0 %1916, %v500_v3   ;;  %605 = vperm.xlu1 %1917, %v503_v6  }
  0x65   : > { %600 = vperm.xlu0 %1916, %v502_v5   ;;  %615 = vperm.xlu1 %1917, %v505_v12  }
  0x67   : > { %1158 = vmatmul.mubr.bf16.gmra.mxu1 %v1964_v63  ;;  %1287 = vmatmul.mubr.bf16.gmra.mxu0 %v1965_v0 }
  0x68   : > { %1165 = vmatprep.mubr.bf16.mxu1 %v1966_v1  ;;  %1294 = vmatprep.mubr.bf16.mxu0 %v1968_v2 }
  0x69   : > { %610 = vperm.xlu0 %1916, %v504_v11   ;;  %625 = vperm.xlu1 %1917, %v507_v14  }
  0x6d   : > { %620 = vperm.xlu0 %1916, %v506_v13  }
  0x6f   : > { %1166 = vmatmul.mubr.bf16.gmra.mxu1 %v1970_v7  ;;  %1295 = vmatmul.mubr.bf16.gmra.mxu0 %v1971_v8 }
  0x70   : > { %1173 = vmatprep.mubr.bf16.mxu1 %v1972_v9  ;;  %1302 = vmatprep.mubr.bf16.mxu0 %v1974_v10 }
  0x77   : > { %1174 = vmatmul.mubr.bf16.gmra.mxu1 %v1976_v15  ;;  %1303 = vmatmul.mubr.bf16.gmra.mxu0 %v1977_v16 }
  0x78   : > { %1181 = vmatprep.mubr.bf16.mxu1 %v1978_v17  ;;  %1310 = vmatprep.mubr.bf16.mxu0 %v1980_v18 }
  0x7f   : > { %1182 = vmatmul.mubr.bf16.gmra.mxu1 %v1982_v19  ;;  %1311 = vmatmul.mubr.bf16.gmra.mxu0 %v1983_v20 }
  0x80   : > { %1189 = vmatprep.mubr.bf16.mxu1 %v1984_v21  ;;  %1318 = vmatprep.mubr.bf16.mxu0 %v1986_v22 }
  0x87   : > { %1190 = vmatmul.mubr.bf16.gmra.mxu1 %v1988_v23  ;;  %1319 = vmatmul.mubr.bf16.gmra.mxu0 %v1989_v24 }
  0x88   : > { %1197 = vmatprep.mubr.bf16.mxu1 %v1990_v25  ;;  %1326 = vmatprep.mubr.bf16.mxu0 %v1992_v26 }
  0x8f   : > { %1198 = vmatmul.mubr.bf16.gmra.mxu1 %v1994_v27  ;;  %1327 = vmatmul.mubr.bf16.gmra.mxu0 %v1995_v28 }
  0x90   : > { %1205 = vmatprep.mubr.bf16.mxu1 %v1996_v29  ;;  %1334 = vmatprep.mubr.bf16.mxu0 %v1998_v30 }
  0x97   : > { %1206 = vmatmul.mubr.bf16.gmra.mxu1 %v2000_v31  ;;  %1335 = vmatmul.mubr.bf16.gmra.mxu0 %v2001_v32 }
  0x98   : > { %1213 = vmatprep.mubr.bf16.mxu1 %v2002_v33  ;;  %1342 = vmatprep.mubr.bf16.mxu0 %v2004_v34 }
  0x9f   : > { %1214 = vmatmul.mubr.bf16.gmra.mxu1 %v2006_v35  ;;  %1343 = vmatmul.mubr.bf16.gmra.mxu0 %v2007_v36 }
  0xa0   : > { %1221 = vmatprep.mubr.bf16.mxu1 %v2008_v37  ;;  %1350 = vmatprep.mubr.bf16.mxu0 %v2010_v38 }
  0xa7   : > { %1222 = vmatmul.mubr.bf16.gmra.mxu1 %v2012_v39  ;;  %1351 = vmatmul.mubr.bf16.gmra.mxu0 %v2013_v40 }
  0xa8   : > { %1229 = vmatprep.mubr.bf16.mxu1 %v2014_v41  ;;  %1358 = vmatprep.mubr.bf16.mxu0 %v2016_v42 }
  0xaf   : > { %1230 = vmatmul.mubr.bf16.gmra.mxu1 %v2018_v43  ;;  %1359 = vmatmul.mubr.bf16.gmra.mxu0 %v2019_v44  ;;  %v511_v44 = vpop.permute.xlu0 %510 }
  0xb0   : > { %1237 = vmatprep.mubr.bf16.mxu1 %v2020_v45  ;;  %1366 = vmatprep.mubr.bf16.mxu0 %v2022_v46 }
  0xb7   : > { %1238 = vmatmul.mubr.bf16.gmra.mxu1 %v2024_v47  ;;  %1367 = vmatmul.mubr.bf16.gmra.mxu0 %v2025_v48 }
  0xef   : > { %v1626_v49 = vpop.f32.mrf.mxu0  ;;  %v1662_v50 = vpop.f32.mrf.mxu1 }
  0xf1   : > { %v1627_v51 = vpop.f32.mrf.mxu0  ;;  %v1663_v52 = vpop.f32.mrf.mxu1 }
  0xf2   : > { %v2492_v53 = vadd.f32 %v1663_v52, %v1662_v50  ;;  %v1628_v45 = vadd.f32 %v1627_v51, %v1626_v49 }
  0xf3   : > { %v1629_v54 = vpop.f32.mrf.mxu0  ;;  %v1665_v55 = vpop.f32.mrf.mxu1 }
  0xf5   : > { %v1630_v56 = vpop.f32.mrf.mxu0  ;;  %v1666_v57 = vpop.f32.mrf.mxu1 }
  0xf6   : > { %v2494_v58 = vadd.f32 %v1666_v57, %v1665_v55  ;;  %v1023_v55 = vadd.f32 %v1628_v45, %v511_v44  ;;  %v1631_v57 = vadd.f32 %v1630_v56, %v1629_v54 }
  0xf7   : > { %v2496_v59 = vpop.f32.mrf.mxu0  ;;  %v1668_v60 = vpop.f32.mrf.mxu1 }
  0xf9   : > { %v2498_v61 = vpop.f32.mrf.mxu0  ;;  %v1669_v62 = vpop.f32.mrf.mxu1 }
  0xfa   : > { %v2500_v63 = vadd.f32 %v1669_v62, %v1668_v60  ;;  %v1634_v54 = vadd.f32 %v2498_v61, %v2496_v59 }
  0xfb   : > { %v2502_v0 = vpop.f32.mrf.mxu0  ;;  %v1671_v1 = vpop.f32.mrf.mxu1 }
  0xfd   : > { %v2504_v2 = vpop.f32.mrf.mxu0  ;;  %v1672_v3 = vpop.f32.mrf.mxu1 }
  0xfe   : > { %v2506_v4 = vadd.f32 %v1672_v3, %v1671_v1  ;;  %v516_v3 = vpop.permute.xlu0 %515 }
  0xff   : > { %v2508_v5 = vpop.f32.mrf.mxu0  ;;  %v1674_v6 = vpop.f32.mrf.mxu1 }
 0x101   : > { %v2510_v7 = vpop.f32.mrf.mxu0  ;;  %v1675_v8 = vpop.f32.mrf.mxu1 }
 0x102   : > { %v2512_v9 = vadd.f32 %v1675_v8, %v1674_v6 }
 0x103   : > { %v2514_v10 = vpop.f32.mrf.mxu0  ;;  %v1677_v11 = vpop.f32.mrf.mxu1 }
 0x105   : > { %v2516_v12 = vpop.f32.mrf.mxu0  ;;  %v1678_v13 = vpop.f32.mrf.mxu1 }
 0x106   : > { %v2518_v14 = vadd.f32 %v1678_v13, %v1677_v11  ;;  %v521_v11 = vpop.permute.xlu1 %520  ;;  %v1026_v13 = vadd.f32 %v1631_v57, %v516_v3 }
 0x107   : > { %v2520_v15 = vpop.f32.mrf.mxu0  ;;  %v1680_v16 = vpop.f32.mrf.mxu1 }
 0x109   : > { %v2522_v17 = vpop.f32.mrf.mxu0  ;;  %v1681_v18 = vpop.f32.mrf.mxu1 }
 0x10a   : > { %v2524_v19 = vadd.f32 %v1681_v18, %v1680_v16  ;;  %v526_v61 = vpop.permute.xlu1 %525 }
 0x10b   : > { %v2526_v20 = vpop.f32.mrf.mxu0  ;;  %v1683_v21 = vpop.f32.mrf.mxu1 }
 0x10d   : > { %v2528_v22 = vpop.f32.mrf.mxu0  ;;  %v1684_v23 = vpop.f32.mrf.mxu1 }
 0x10e   : > { %v2530_v24 = vadd.f32 %v1684_v23, %v1683_v21 }
 0x10f   : > { %v2532_v25 = vpop.f32.mrf.mxu0  ;;  %v1686_v26 = vpop.f32.mrf.mxu1 }
 0x111   : > { %v2534_v27 = vpop.f32.mrf.mxu0  ;;  %v1687_v28 = vpop.f32.mrf.mxu1 }
 0x112   : > { %v2536_v29 = vadd.f32 %v1687_v28, %v1686_v26 }
 0x113   : > { %v2538_v30 = vpop.f32.mrf.mxu0  ;;  %v1689_v31 = vpop.f32.mrf.mxu1 }
 0x115   : > { %v2540_v32 = vpop.f32.mrf.mxu0  ;;  %v1690_v33 = vpop.f32.mrf.mxu1 }
 0x116   : > { %v2542_v34 = vadd.f32 %v1690_v33, %v1689_v31  ;;  %v1031_v33 = vadd.f32 %v1634_v54, %v521_v11 }
 0x117   : > { %v2544_v35 = vpop.f32.mrf.mxu0  ;;  %v1692_v36 = vpop.f32.mrf.mxu1 }
 0x119   : > { %v2546_v37 = vpop.f32.mrf.mxu0  ;;  %v1693_v38 = vpop.f32.mrf.mxu1 }
 0x11a   : > { %v2548_v39 = vadd.f32 %v1693_v38, %v1692_v36  ;;  %v1637_v36 = vadd.f32 %v2504_v2, %v2502_v0 }
 0x11b   : > { %v2550_v40 = vpop.f32.mrf.mxu0  ;;  %v1695_v41 = vpop.f32.mrf.mxu1 }
 0x11d   : > { %v2552_v42 = vpop.f32.mrf.mxu0  ;;  %v1696_v43 = vpop.f32.mrf.mxu1 }
 0x11e   : > { %v2554_v46 = vadd.f32 %v1696_v43, %v1695_v41 }
 0x11f   : > { %v1714_v47 = vpop.f32.mrf.mxu1  ;;  %v1802_v48 = vpop.f32.mrf.mxu0 }
 0x121   : > { %v1715_v50 = vpop.f32.mrf.mxu1  ;;  %v1803_v52 = vpop.f32.mrf.mxu0 }
 0x122   : > { %v1716_v60 = vadd.f32 %v1715_v50, %v1714_v47  ;;  %v1804_v8 = vadd.f32 %v1803_v52, %v1802_v48  ;;  %v1034_v50 = vadd.f32 %v1637_v36, %v526_v61  ;;  %v1640_v52 = vadd.f32 %v2510_v7, %v2508_v5 }
 0x123   : > { %v1717_v62 = vpop.f32.mrf.mxu1  ;;  %v1805_v1 = vpop.f32.mrf.mxu0 }
 0x124   : > { %v1152_v6 = vadd.f32 %v1716_v60, %v1023_v55  ;;  %v531_v60 = vpop.permute.xlu0 %530 }
 0x125   : > { %v1718_v49 = vpop.f32.mrf.mxu1  ;;  %v1806_v51 = vpop.f32.mrf.mxu0 }
 0x126   : > { %v1281_v56 = vadd.f32 %v1804_v8, %v1152_v6  ;;  %v1719_v16 = vadd.f32 %v1718_v49, %v1717_v62  ;;  %v1807_v26 = vadd.f32 %v1806_v51, %v1805_v1  ;;  %v1039_v8 = vadd.f32 %v1640_v52, %v531_v60 }
 0x127   : > { %v1720_v18 = vpop.f32.mrf.mxu1  ;;  %v1808_v21 = vpop.f32.mrf.mxu0  ;;  %v1643_v49 = vadd.f32 %v2516_v12, %v2514_v10 }
 0x128   : > { %1376 = vst.msk [vmem:[%s2561_s19] sm:$0xff] %vm1375_vm0, %v1281_v56  ;;  %v1155_v23 = vadd.f32 %v1719_v16, %v1026_v13  ;;  %v536_v13 = vpop.permute.xlu1 %535 }
 0x129   : > { %v1721_v28 = vpop.f32.mrf.mxu1  ;;  %v1809_v31 = vpop.f32.mrf.mxu0 }
 0x12a   : > { %v1284_v38 = vadd.f32 %v1807_v26, %v1155_v23  ;;  %v1722_v41 = vadd.f32 %v1721_v28, %v1720_v18  ;;  %v1810_v45 = vadd.f32 %v1809_v31, %v1808_v21  ;;  %v1042_v21 = vadd.f32 %v1643_v49, %v536_v13  ;;  %v541_v31 = vpop.permute.xlu0 %540 }
 0x12b   : > { %v1723_v43 = vpop.f32.mrf.mxu1  ;;  %v1811_v59 = vpop.f32.mrf.mxu0  ;;  %v1646_v23 = vadd.f32 %v2522_v17, %v2520_v15  ;;  %v1655_v49 = vadd.f32 %v2540_v32, %v2538_v30 }
 0x12c   : > { %1377 = vst.msk [vmem:[%s2561_s19 + $0x8] sm:$0xff] %vm1375_vm0, %v1284_v38  ;;  %v1160_v44 = vadd.f32 %v1722_v41, %v1031_v33 }
 0x12d   : > { %v1724_v47 = vpop.f32.mrf.mxu1  ;;  %v1812_v48 = vpop.f32.mrf.mxu0 }
 0x12e   : > { %v1289_v55 = vadd.f32 %v1810_v45, %v1160_v44  ;;  %v1725_v57 = vadd.f32 %v1724_v47, %v1723_v43  ;;  %v1813_v1 = vadd.f32 %v1812_v48, %v1811_v59  ;;  %v1047_v43 = vadd.f32 %v1646_v23, %v541_v31  ;;  %v546_v45 = vpop.permute.xlu1 %545  ;;  %v551_v60 = vpop.permute.xlu0 %550 }
 0x12f   : > { %v1726_v0 = vpop.f32.mrf.mxu1  ;;  %v1814_v2 = vpop.f32.mrf.mxu0  ;;  %v1649_v59 = vadd.f32 %v2528_v22, %v2526_v20 }
 0x130   : > { %1378 = vst.msk [vmem:[%s2561_s19 + $0x10] sm:$0xff] %vm1375_vm0, %v1289_v55  ;;  %v1163_v62 = vadd.f32 %v1725_v57, %v1034_v50  ;;  %v1652_v57 = vadd.f32 %v2534_v27, %v2532_v25 }
 0x131   : > { %v1727_v3 = vpop.f32.mrf.mxu1  ;;  %v1815_v6 = vpop.f32.mrf.mxu0  ;;  %v1050_v55 = vadd.f32 %v1649_v59, %v546_v45 }
 0x132   : > { %v1292_v51 = vadd.f32 %v1813_v1, %v1163_v62  ;;  %v1728_v11 = vadd.f32 %v1727_v3, %v1726_v0  ;;  %v1816_v56 = vadd.f32 %v1815_v6, %v1814_v2 }
 0x133   : > { %v1729_v5 = vpop.f32.mrf.mxu1  ;;  %v1817_v7 = vpop.f32.mrf.mxu0 }
 0x134   : > { %1379 = vst.msk [vmem:[%s2561_s19 + $0x18] sm:$0xff] %vm1375_vm0, %v1292_v51  ;;  %v1168_v54 = vadd.f32 %v1728_v11, %v1039_v8  ;;  %v1055_v8 = vadd.f32 %v1652_v57, %v551_v60 }
 0x135   : > { %v1730_v16 = vpop.f32.mrf.mxu1  ;;  %v1818_v18 = vpop.f32.mrf.mxu0 }
 0x136   : > { %v1297_v26 = vadd.f32 %v1816_v56, %v1168_v54  ;;  %v1731_v28 = vadd.f32 %v1730_v16, %v1729_v5  ;;  %v1819_v36 = vadd.f32 %v1818_v18, %v1817_v7  ;;  %v556_v5 = vpop.permute.xlu1 %555  ;;  %v1658_v18 = vadd.f32 %v2546_v37, %v2544_v35 }
 0x137   : > { %v1732_v10 = vpop.f32.mrf.mxu1  ;;  %v1820_v12 = vpop.f32.mrf.mxu0  ;;  %v1058_v16 = vadd.f32 %v1655_v49, %v556_v5 }
 0x138   : > { %1380 = vst.msk [vmem:[%s2561_s19 + $0x20] sm:$0xff] %vm1375_vm0, %v1297_v26  ;;  %v1171_v33 = vadd.f32 %v1731_v28, %v1042_v21  ;;  %v561_v26 = vpop.permute.xlu0 %560 }
 0x139   : > { %v1733_v38 = vpop.f32.mrf.mxu1  ;;  %v1821_v41 = vpop.f32.mrf.mxu0 }
 0x13a   : > { %v1300_v61 = vadd.f32 %v1819_v36, %v1171_v33  ;;  %v1734_v44 = vadd.f32 %v1733_v38, %v1732_v10  ;;  %v1822_v48 = vadd.f32 %v1821_v41, %v1820_v12  ;;  %v1063_v33 = vadd.f32 %v1658_v18, %v561_v26 }
 0x13b   : > { %v1735_v15 = vpop.f32.mrf.mxu1  ;;  %v1823_v17 = vpop.f32.mrf.mxu0  ;;  %v1661_v36 = vadd.f32 %v2552_v42, %v2550_v40 }
 0x13c   : > { %1381 = vst.msk [vmem:[%s2561_s19 + $0x28] sm:$0xff] %vm1375_vm0, %v1300_v61  ;;  %v1176_v47 = vadd.f32 %v1734_v44, %v1047_v43  ;;  %v566_v43 = vpop.permute.xlu1 %565 }
 0x13d   : > { %v1736_v50 = vpop.f32.mrf.mxu1  ;;  %v1824_v52 = vpop.f32.mrf.mxu0  ;;  %v1066_v45 = vadd.f32 %v1661_v36, %v566_v43 }
 0x13e   : > { %v1305_v0 = vadd.f32 %v1822_v48, %v1176_v47  ;;  %v1737_v2 = vadd.f32 %v1736_v50, %v1735_v15  ;;  %v1825_v1 = vadd.f32 %v1824_v52, %v1823_v17  ;;  %v571_v17 = vpop.permute.xlu0 %570 }
 0x13f   : > { %v1738_v20 = vpop.f32.mrf.mxu1  ;;  %v1826_v22 = vpop.f32.mrf.mxu0 }
 0x140   : > { %1382 = vst.msk [vmem:[%s2561_s19 + $0x30] sm:$0xff] %vm1375_vm0, %v1305_v0  ;;  %v1179_v62 = vadd.f32 %v1737_v2, %v1050_v55  ;;  %v1071_v0 = vadd.f32 %v2492_v53, %v571_v17  ;;  %v576_v2 = vpop.permute.xlu1 %575 }
 0x141   : > { %v1739_v3 = vpop.f32.mrf.mxu1  ;;  %v1827_v6 = vpop.f32.mrf.mxu0  ;;  %v1074_v49 = vadd.f32 %v2494_v58, %v576_v2 }
 0x142   : > { %v1308_v51 = vadd.f32 %v1825_v1, %v1179_v62  ;;  %v1740_v11 = vadd.f32 %v1739_v3, %v1738_v20  ;;  %v1828_v13 = vadd.f32 %v1827_v6, %v1826_v22 }
 0x143   : > { %v1741_v25 = vpop.f32.mrf.mxu1  ;;  %v1829_v27 = vpop.f32.mrf.mxu0 }
 0x144   : > { %1383 = vst.msk [vmem:[%s2561_s19 + $0x38] sm:$0xff] %vm1375_vm0, %v1308_v51  ;;  %v1184_v7 = vadd.f32 %v1740_v11, %v1055_v8  ;;  %v581_v51 = vpop.permute.xlu0 %580 }
 0x145   : > { %v1742_v54 = vpop.f32.mrf.mxu1  ;;  %v1830_v56 = vpop.f32.mrf.mxu0 }
 0x146   : > { %v1313_v21 = vadd.f32 %v1828_v13, %v1184_v7  ;;  %v1743_v23 = vadd.f32 %v1742_v54, %v1741_v25  ;;  %v1831_v10 = vadd.f32 %v1830_v56, %v1829_v27  ;;  %v1079_v56 = vadd.f32 %v2500_v63, %v581_v51 }
 0x147   : > { %v1744_v30 = vpop.f32.mrf.mxu1  ;;  %v1832_v32 = vpop.f32.mrf.mxu0 }
 0x148   : > { %1384 = vst.msk [vmem:[%s2561_s19 + $0x40] sm:$0xff] %vm1375_vm0, %v1313_v21  ;;  %v1187_v28 = vadd.f32 %v1743_v23, %v1058_v16  ;;  %v586_v16 = vpop.permute.xlu1 %585 }
 0x149   : > { %v1745_v12 = vpop.f32.mrf.mxu1  ;;  %v1833_v31 = vpop.f32.mrf.mxu0 }
 0x14a   : > { %v1316_v38 = vadd.f32 %v1831_v10, %v1187_v28  ;;  %v1746_v41 = vadd.f32 %v1745_v12, %v1744_v30  ;;  %v1834_v61 = vadd.f32 %v1833_v31, %v1832_v32  ;;  %v1082_v10 = vadd.f32 %v2506_v4, %v586_v16  ;;  %v591_v12 = vpop.permute.xlu0 %590 }
 0x14b   : > { %v1747_v35 = vpop.f32.mrf.mxu1  ;;  %v1835_v37 = vpop.f32.mrf.mxu0  ;;  %v1087_v43 = vadd.f32 %v2512_v9, %v591_v12 }
 0x14c   : > { %1385 = vst.msk [vmem:[%s2561_s19 + $0x48] sm:$0xff] %vm1375_vm0, %v1316_v38  ;;  %v1192_v59 = vadd.f32 %v1746_v41, %v1063_v33 }
 0x14d   : > { %v1748_v44 = vpop.f32.mrf.mxu1  ;;  %v1836_v15 = vpop.f32.mrf.mxu0 }
 0x14e   : > { %v1321_v47 = vadd.f32 %v1834_v61, %v1192_v59  ;;  %v1749_v48 = vadd.f32 %v1748_v44, %v1747_v35  ;;  %v1837_v42 = vadd.f32 %v1836_v15, %v1835_v37  ;;  %v596_v59 = vpop.permute.xlu1 %595 }
 0x14f   : > { %v1750_v50 = vpop.f32.mrf.mxu1  ;;  %v1838_v52 = vpop.f32.mrf.mxu0 }
 0x150   : > { %1386 = vst.msk [vmem:[%s2561_s19 + $0x50] sm:$0xff] %vm1375_vm0, %v1321_v47  ;;  %v1195_v40 = vadd.f32 %v1749_v48, %v1066_v45 }
 0x151   : > { %v1751_v55 = vpop.f32.mrf.mxu1  ;;  %v1839_v57 = vpop.f32.mrf.mxu0 }
 0x152   : > { %v1324_v20 = vadd.f32 %v1837_v42, %v1195_v40  ;;  %v1752_v22 = vadd.f32 %v1751_v55, %v1750_v50  ;;  %v1840_v3 = vadd.f32 %v1839_v57, %v1838_v52  ;;  %v1090_v50 = vadd.f32 %v2518_v14, %v596_v59  ;;  %v601_v52 = vpop.permute.xlu0 %600 }
 0x153   : > { %v1753_v60 = vpop.f32.mrf.mxu1  ;;  %v1841_v62 = vpop.f32.mrf.mxu0 }
 0x154   : > { %1387 = vst.msk [vmem:[%s2561_s19 + $0x58] sm:$0xff] %vm1375_vm0, %v1324_v20  ;;  %v1200_v1 = vadd.f32 %v1752_v22, %v1071_v0  ;;  %v1095_v22 = vadd.f32 %v2524_v19, %v601_v52 }
 0x155   : > { %v1754_v6 = vpop.f32.mrf.mxu1  ;;  %v1842_v8 = vpop.f32.mrf.mxu0 }
 0x156   : > { %v1329_v11 = vadd.f32 %v1840_v3, %v1200_v1  ;;  %v1755_v25 = vadd.f32 %v1754_v6, %v1753_v60  ;;  %v1843_v7 = vadd.f32 %v1842_v8, %v1841_v62  ;;  %v606_v60 = vpop.permute.xlu1 %605 }
 0x157   : > { %v1756_v27 = vpop.f32.mrf.mxu1  ;;  %v1844_v53 = vpop.f32.mrf.mxu0 }
 0x158   : > { %1388 = vst.msk [vmem:[%s2561_s19 + $0x60] sm:$0xff] %vm1375_vm0, %v1329_v11  ;;  %v1203_v5 = vadd.f32 %v1755_v25, %v1074_v49  ;;  %v1098_v11 = vadd.f32 %v2530_v24, %v606_v60  ;;  %v611_v25 = vpop.permute.xlu0 %610 }
 0x159   : > { %v1757_v13 = vpop.f32.mrf.mxu1  ;;  %v1845_v54 = vpop.f32.mrf.mxu0  ;;  %v1103_v16 = vadd.f32 %v2536_v29, %v611_v25 }
 0x15a   : > { %v1332_v18 = vadd.f32 %v1843_v7, %v1203_v5  ;;  %v1758_v21 = vadd.f32 %v1757_v13, %v1756_v27  ;;  %v1846_v32 = vadd.f32 %v1845_v54, %v1844_v53 }
 0x15b   : > { %v1759_v23 = vpop.f32.mrf.mxu1  ;;  %v1847_v58 = vpop.f32.mrf.mxu0 }
 0x15c   : > { %1389 = vst.msk [vmem:[%s2561_s19 + $0x68] sm:$0xff] %vm1375_vm0, %v1332_v18  ;;  %v1208_v30 = vadd.f32 %v1758_v21, %v1079_v56  ;;  %v616_v18 = vpop.permute.xlu1 %615  ;;  %v621_v12 = vpop.permute.xlu0 %620 }
 0x15d   : > { %v1760_v26 = vpop.f32.mrf.mxu1  ;;  %v1848_v28 = vpop.f32.mrf.mxu0 }
 0x15e   : > { %v1337_v31 = vadd.f32 %v1846_v32, %v1208_v30  ;;  %v1761_v33 = vadd.f32 %v1760_v26, %v1759_v23  ;;  %v1849_v41 = vadd.f32 %v1848_v28, %v1847_v58 }
 0x15f   : > { %v1762_v36 = vpop.f32.mrf.mxu1  ;;  %v1850_v63 = vpop.f32.mrf.mxu0 }
 0x160   : > { %1390 = vst.msk [vmem:[%s2561_s19 + $0x70] sm:$0xff] %vm1375_vm0, %v1337_v31  ;;  %v1211_v38 = vadd.f32 %v1761_v33, %v1082_v10  ;;  %v1106_v10 = vadd.f32 %v2542_v34, %v616_v18 }
 0x161   : > { %v1763_v35 = vpop.f32.mrf.mxu1  ;;  %v1851_v37 = vpop.f32.mrf.mxu0 }
 0x162   : > { %v1340_v61 = vadd.f32 %v1849_v41, %v1211_v38  ;;  %v1764_v44 = vadd.f32 %v1763_v35, %v1762_v36  ;;  %v1852_v45 = vadd.f32 %v1851_v37, %v1850_v63  ;;  %v1111_v37 = vadd.f32 %v2548_v39, %v621_v12 }
 0x163   : > { %v1765_v15 = vpop.f32.mrf.mxu1  ;;  %v1853_v4 = vpop.f32.mrf.mxu0 }
 0x164   : > { %1391 = vst.msk [vmem:[%s2561_s19 + $0x78] sm:$0xff] %vm1375_vm0, %v1340_v61  ;;  %v1216_v17 = vadd.f32 %v1764_v44, %v1087_v43  ;;  %v626_v43 = vpop.permute.xlu1 %625 }
 0x165   : > { %v1766_v47 = vpop.f32.mrf.mxu1  ;;  %v1854_v48 = vpop.f32.mrf.mxu0 }
 0x166   : > { %v1345_v40 = vadd.f32 %v1852_v45, %v1216_v17  ;;  %v1767_v42 = vadd.f32 %v1766_v47, %v1765_v15  ;;  %v1855_v0 = vadd.f32 %v1854_v48, %v1853_v4  ;;  %v1114_v47 = vadd.f32 %v2554_v46, %v626_v43 }
 0x167   : > { %v1768_v55 = vpop.f32.mrf.mxu1  ;;  %v1856_v9 = vpop.f32.mrf.mxu0 }
 0x168   : > { %1392 = vst.msk [vmem:[%s2561_s19 + $0x80] sm:$0xff] %vm1375_vm0, %v1345_v40  ;;  %v1219_v57 = vadd.f32 %v1767_v42, %v1090_v50 }
 0x169   : > { %v1769_v2 = vpop.f32.mrf.mxu1  ;;  %v1857_v20 = vpop.f32.mrf.mxu0 }
 0x16a   : > { %v1348_v62 = vadd.f32 %v1855_v0, %v1219_v57  ;;  %v1770_v1 = vadd.f32 %v1769_v2, %v1768_v55  ;;  %v1858_v8 = vadd.f32 %v1857_v20, %v1856_v9 }
 0x16b   : > { %v1771_v3 = vpop.f32.mrf.mxu1  ;;  %v1859_v14 = vpop.f32.mrf.mxu0 }
 0x16c   : > { %1393 = vst.msk [vmem:[%s2561_s19 + $0x88] sm:$0xff] %vm1375_vm0, %v1348_v62  ;;  %v1224_v6 = vadd.f32 %v1770_v1, %v1095_v22 }
 0x16d   : > { %v1772_v49 = vpop.f32.mrf.mxu1  ;;  %v1860_v51 = vpop.f32.mrf.mxu0 }
 0x16e   : > { %v1353_v27 = vadd.f32 %v1858_v8, %v1224_v6  ;;  %v1773_v53 = vadd.f32 %v1772_v49, %v1771_v3  ;;  %v1861_v13 = vadd.f32 %v1860_v51, %v1859_v14 }
 0x16f   : > { %v1774_v5 = vpop.f32.mrf.mxu1  ;;  %v1862_v19 = vpop.f32.mrf.mxu0 }
 0x170   : > { %1394 = vst.msk [vmem:[%s2561_s19 + $0x90] sm:$0xff] %vm1375_vm0, %v1353_v27  ;;  %v1227_v7 = vadd.f32 %v1773_v53, %v1098_v11 }
 0x171   : > { %v1775_v54 = vpop.f32.mrf.mxu1  ;;  %v1863_v56 = vpop.f32.mrf.mxu0 }
 0x172   : > { %v1356_v21 = vadd.f32 %v1861_v13, %v1227_v7  ;;  %v1776_v23 = vadd.f32 %v1775_v54, %v1774_v5  ;;  %v1864_v32 = vadd.f32 %v1863_v56, %v1862_v19 }
 0x173   : > { %v1777_v58 = vpop.f32.mrf.mxu1  ;;  %v1865_v24 = vpop.f32.mrf.mxu0 }
 0x174   : > { %1395 = vst.msk [vmem:[%s2561_s19 + $0x98] sm:$0xff] %vm1375_vm0, %v1356_v21  ;;  %v1232_v30 = vadd.f32 %v1776_v23, %v1103_v16 }
 0x175   : > { %v1778_v26 = vpop.f32.mrf.mxu1  ;;  %v1866_v28 = vpop.f32.mrf.mxu0 }
 0x176   : > { %v1361_v31 = vadd.f32 %v1864_v32, %v1232_v30  ;;  %v1779_v33 = vadd.f32 %v1778_v26, %v1777_v58  ;;  %v1867_v38 = vadd.f32 %v1866_v28, %v1865_v24 }
 0x177   : > { %v1780_v36 = vpop.f32.mrf.mxu1  ;;  %v1868_v29 = vpop.f32.mrf.mxu0 }
 0x178   : > { %1396 = vst.msk [vmem:[%s2561_s19 + $0xa0] sm:$0xff] %vm1375_vm0, %v1361_v31  ;;  %v1235_v63 = vadd.f32 %v1779_v33, %v1106_v10 }
 0x179   : > { %v1781_v41 = vpop.f32.mrf.mxu1  ;;  %v1869_v35 = vpop.f32.mrf.mxu0 }
 0x17a   : > { %v1364_v59 = vadd.f32 %v1867_v38, %v1235_v63  ;;  %v1782_v61 = vadd.f32 %v1781_v41, %v1780_v36  ;;  %v1870_v4 = vadd.f32 %v1869_v35, %v1868_v29 }
 0x17b   : > { %v1783_v34 = vpop.f32.mrf.mxu1  ;;  %v1871_v44 = vpop.f32.mrf.mxu0 }
 0x17c   : > { %1397 = vst.msk [vmem:[%s2561_s19 + $0xa8] sm:$0xff] %vm1375_vm0, %v1364_v59  ;;  %v1240_v15 = vadd.f32 %v1782_v61, %v1111_v37 }
 0x17d   : > { %v1784_v17 = vpop.f32.mrf.mxu1  ;;  %v1872_v45 = vpop.f32.mrf.mxu0 }
 0x17e   : > { %v1369_v48 = vadd.f32 %v1870_v4, %v1240_v15  ;;  %v1785_v50 = vadd.f32 %v1784_v17, %v1783_v34  ;;  %v1873_v39 = vadd.f32 %v1872_v45, %v1871_v44 }
 0x180   : > { %1398 = vst.msk [vmem:[%s2561_s19 + $0xb0] sm:$0xff] %vm1375_vm0, %v1369_v48  ;;  %v1243_v52 = vadd.f32 %v1785_v50, %v1114_v47 }
 0x182   : > { %v1372_v40 = vadd.f32 %v1873_v39, %v1243_v52 }
 0x184   : > { %1399 = vst.msk [vmem:[%s2561_s19 + $0xb8] sm:$0xff] %vm1375_vm0, %v1372_v40 }
 0x185 PF: > { %s13_s14 = sadd.s32 1, %s2048_s14   ;;  %s2656_s12 = smov %s2044_s13 }
 0x186   : > { %p10_p5 = scmp.ge.s32.totalorder %s13_s14, 6   ;;  %s2657_s13 = smov %s2659_s15 }
 0x188   :  { %12 = sbr.rel (!%p10_p5) target bundleno = 2 (0x2), region = 68 }

</bundles_post_ra>
